<compile_context>
chip_gen: v5e
topology: v5e:2x2
jax: 0.10.0
libtpu: 0.0.40
codegen_flags: <defaults>
</compile_context>

<pallas_src>
import functools

import jax
import jax.numpy as jnp
from jax import lax
from jax.experimental import pallas as pl
from jax.experimental.pallas import tpu as pltpu

# ---- Model3 dims and G=3 grouped packing layout ----------------------------
_DIMS = [(42, 7), (7, 7), (7, 7), (7, 7), (7, 7)]   # per-layer (fan_in, fan_out)
_IN, _OUT = 42, 7
_G = 3                       # batch-group factor (block-diagonal weights)
_GIN = _G * _IN              # 126
_GOUT = _G * _OUT            # 21

# Row offsets (8-aligned starts) of each block-diag weight inside the packed
# slab, followed by an 8-row block holding the 5 tiled biases.
_W_OFFS = [0, 128, 152, 176, 200]
_W_ROWS = [_GIN, _GOUT, _GOUT, _GOUT, _GOUT]   # 126, 21, 21, 21, 21
_B_OFF = 224
_SLAB_ROWS = 232             # 224 weight rows + 8 bias rows

_SUB = 128                   # grouped rows per in-kernel sub-chunk (vreg-resident)


def pack_params(params):
    """Pack [(W1,b1)...(W5,b5)] (W as (in,out), b as (out,)) into one (232, 21)
    f32 slab of G=3 block-diagonal weights + tiled biases."""
    def blockdiag(w):
        fin, fout = w.shape
        bd = jnp.zeros((_G * fin, _G * fout), jnp.float32)
        for g in range(_G):
            bd = bd.at[g * fin:(g + 1) * fin, g * fout:(g + 1) * fout].set(
                w.astype(jnp.float32))
        return bd

    slab = jnp.zeros((_SLAB_ROWS, _GOUT), jnp.float32)
    for i, (w, b) in enumerate(params):
        bd = blockdiag(w)
        slab = slab.at[_W_OFFS[i]:_W_OFFS[i] + bd.shape[0], :].set(bd)
        slab = slab.at[_B_OFF + i, :].set(
            jnp.tile(jnp.reshape(b, (-1,)).astype(jnp.float32), _G))
    return slab


def _mlp_kernel(x_ref, p_ref, o_ref):
    """Fused 5-layer MLP on one grouped batch tile.

    x_ref: (TB, 126) bf16, p_ref: (232, 21) f32, o_ref: (TB, 21) f32.
    """
    tb = x_ref.shape[0]
    sub = min(tb, _SUB)          # sub-chunk rows (static); tb % sub == 0 (wrapper)
    n_sub = tb // sub

    # Cast weight blocks to bf16 once per grid step (packed 16-row bf16 vregs
    # for the MXU); reused by every inner sub-chunk.
    ws = [p_ref[_W_OFFS[i]:_W_OFFS[i] + _W_ROWS[i], :].astype(jnp.bfloat16)
          for i in range(5)]
    # One aligned 8-row load for all five biases (stays f32).
    bias = p_ref[_B_OFF:_B_OFF + 8, :]           # (8, 21) f32

    def body(c, carry):
        r = pl.multiple_of(c * sub, sub)
        h = x_ref[pl.ds(r, sub), :]              # (sub, 126) bf16
        for i in range(5):
            h = jnp.dot(h, ws[i], preferred_element_type=jnp.float32)
            h = h + bias[i:i + 1, :]             # f32 bias add
            if i < 4:
                # ReLU in f32; Dropout -> identity (eval mode); re-pack to bf16
                # for the next MXU push.
                h = jnp.maximum(h, 0.0).astype(jnp.bfloat16)
        o_ref[pl.ds(r, sub), :] = h              # (sub, 21) f32
        return carry

    # Short fixed trip count -> fully unrolled, intermediates stay in vregs.
    lax.fori_loop(0, n_sub, body, 0, unroll=True)


def _round_up(n, m):
    return (n + m - 1) // m * m


@functools.partial(jax.jit, static_argnames=("block_bg",))
def model3_forward(x, param_slab, block_bg=512):
    """x: (B, 42) (nn.Flatten output). param_slab: (232, 21) from pack_params().
    Returns (B, 7) float32 logits."""
    B = x.shape[0]

    # bf16 activations into the kernel: halves HBM read traffic and feeds the
    # MXU packed bf16 operands.  Accumulation / bias / ReLU stay f32 in-kernel.
    x = x.astype(jnp.bfloat16)

    # G=3 batch grouping: (B, 42) -> (Bg, 126) is a free contiguous reshape;
    # block-diagonal weights keep the 3 grouped samples independent.
    Bg = -(-B // _G)
    if Bg * _G != B:
        x = jnp.pad(x, ((0, Bg * _G - B), (0, 0)))
    xg = x.reshape(Bg, _GIN)

    # Grouped batch tile: multiple of 8 sublanes; multiple of the in-kernel
    # sub-chunk when larger; capped at block_bg (=512 grouped rows = 1536
    # samples) so larger batches get >=2 grid steps (v7x dual-TC sharding via
    # "parallel") while double-buffered tiles stay ~1 MiB of VMEM.
    # (v5e/v6e note: raising block_bg toward 2048-4096 grouped rows is fine at
    #  these dtypes; only set vmem_limit_bytes if you go far beyond that.)
    tb = min(_round_up(Bg, 8), block_bg)
    if tb > _SUB:
        tb = _round_up(tb, _SUB)
    bpg = _round_up(Bg, tb)
    if bpg != Bg:
        xg = jnp.pad(xg, ((0, bpg - Bg), (0, 0)))

    out_g = pl.pallas_call(
        _mlp_kernel,
        out_shape=jax.ShapeDtypeStruct((bpg, _GOUT), jnp.float32),
        grid=(bpg // tb,),
        in_specs=[
            pl.BlockSpec((tb, _GIN), lambda i: (i, 0)),
            # Constant index_map -> param slab DMA'd once, VMEM-resident.
            pl.BlockSpec((_SLAB_ROWS, _GOUT), lambda i: (0, 0)),
        ],
        out_specs=pl.BlockSpec((tb, _GOUT), lambda i: (i, 0)),
        compiler_params=pltpu.CompilerParams(
            dimension_semantics=("parallel",)),
    )(xg, param_slab)

    # (Bg, 21) -> (B, 7): free un-grouping reshape + slice off padding.
    return out_g[:Bg].reshape(Bg * _G, _OUT)[:B]


def init_params(key):
    """Deterministic init mimicking nn.Linear default (uniform +-1/sqrt(fan_in))."""
    params = []
    for (fan_in, fan_out) in _DIMS:
        key, kw, kb = jax.random.split(key, 3)
        bound = 1.0 / jnp.sqrt(jnp.float32(fan_in))
        w = jax.random.uniform(kw, (fan_in, fan_out), jnp.float32, -bound, bound)
        b = jax.random.uniform(kb, (fan_out,), jnp.float32, -bound, bound)
        params.append((w, b))
    return params


def reference_forward(x, params):
    """Pure-f32 JAX reference (eval-mode dropout = identity)."""
    h = x.astype(jnp.float32)
    for i, (w, b) in enumerate(params):
        h = h @ w + b
        if i < len(params) - 1:
            h = jnp.maximum(h, 0.0)
    return h


if __name__ == "__main__":
    key = jax.random.PRNGKey(0)
    key, kx = jax.random.split(key)

    # forward() starts with nn.Flatten: (8, 6, 7) -> (8, 42).
    x3 = jax.random.normal(kx, (8, 6, 7), jnp.float32)
    x = x3.reshape(x3.shape[0], -1)

    params = init_params(key)
    slab = pack_params(params)

    out = jax.block_until_ready(model3_forward(x, slab))
    ref = reference_forward(x, params)

    assert out.shape == (8, 7)
    # bf16 MXU operands (f32 accumulation) -> loosened tolerance vs f32 ref.
    max_err = float(jnp.max(jnp.abs(out - ref)))
    assert jnp.allclose(out, ref, atol=5e-2, rtol=5e-2), (
        f"mismatch vs reference, max abs err = {max_err}")

    print("KERNEL_OK")
</pallas_src>

<mosaic_0001>
module attributes {stable_mosaic.version = 11 : i64} {
  func.func @_mlp_kernel(%arg0: i32, %arg1: memref<8x126xbf16, #tpu.memory_space<vmem>>, %arg2: memref<232x21xf32, #tpu.memory_space<vmem>>, %arg3: memref<8x21xf32, #tpu.memory_space<vmem>>) attributes {dimension_semantics = [#tpu.dimension_semantics<parallel>], iteration_bounds = array<i64: 1>, scalar_prefetch = 0 : i64, scratch_operands = 0 : i64, tpu.core_type = #tpu.core_type<tc>, window_params = [{transform_indices = @transform_0, window_bounds = array<i64: 8, 126>}, {pipeline_mode = #tpu.pipeline_mode<synchronous>, transform_indices = @transform_1, window_bounds = array<i64: 232, 21>}, {transform_indices = @transform_2, window_bounds = array<i64: 8, 21>}]} {
    %c0 = arith.constant 0 : index
    %c0_0 = arith.constant 0 : index
    %0 = vector.load %arg2[%c0, %c0_0] : memref<232x21xf32, #tpu.memory_space<vmem>>, vector<126x21xf32>
    %1 = arith.truncf %0 : vector<126x21xf32> to vector<126x21xbf16>
    %c128 = arith.constant 128 : index
    %c0_1 = arith.constant 0 : index
    %2 = vector.load %arg2[%c128, %c0_1] : memref<232x21xf32, #tpu.memory_space<vmem>>, vector<21x21xf32>
    %3 = arith.truncf %2 : vector<21x21xf32> to vector<21x21xbf16>
    %c152 = arith.constant 152 : index
    %c0_2 = arith.constant 0 : index
    %4 = vector.load %arg2[%c152, %c0_2] : memref<232x21xf32, #tpu.memory_space<vmem>>, vector<21x21xf32>
    %5 = arith.truncf %4 : vector<21x21xf32> to vector<21x21xbf16>
    %c176 = arith.constant 176 : index
    %c0_3 = arith.constant 0 : index
    %6 = vector.load %arg2[%c176, %c0_3] : memref<232x21xf32, #tpu.memory_space<vmem>>, vector<21x21xf32>
    %7 = arith.truncf %6 : vector<21x21xf32> to vector<21x21xbf16>
    %c200 = arith.constant 200 : index
    %c0_4 = arith.constant 0 : index
    %8 = vector.load %arg2[%c200, %c0_4] : memref<232x21xf32, #tpu.memory_space<vmem>>, vector<21x21xf32>
    %9 = arith.truncf %8 : vector<21x21xf32> to vector<21x21xbf16>
    %c224 = arith.constant 224 : index
    %c0_5 = arith.constant 0 : index
    %10 = vector.load %arg2[%c224, %c0_5] : memref<232x21xf32, #tpu.memory_space<vmem>>, vector<8x21xf32>
    %c0_i32 = arith.constant 0 : i32
    %c8_i32 = arith.constant 8 : i32
    %11 = arith.muli %c0_i32, %c8_i32 : i32
    %12 = tpu.assume_multiple %11, 8 : i32
    %13 = arith.index_cast %12 : i32 to index
    %c0_6 = arith.constant 0 : index
    %14 = vector.load %arg1[%13, %c0_6] : memref<8x126xbf16, #tpu.memory_space<vmem>>, vector<8x126xbf16>
    %cst = arith.constant dense<0.000000e+00> : vector<8x21xf32>
    %15 = tpu.matmul %14, %1, %cst {dimension_numbers = #tpu.dot_dimension_numbers<[1], [0], [0], [1], [0, 0, 1, 1], [], []>} : vector<8x126xbf16>, vector<126x21xbf16>, vector<8x21xf32> -> vector<8x21xf32>
    %16 = vector.extract_strided_slice %10 {offsets = [0, 0], sizes = [1, 21], strides = [1, 1]} : vector<8x21xf32> to vector<1x21xf32>
    %17 = vector.broadcast %16 : vector<1x21xf32> to vector<8x21xf32>
    %18 = arith.addf %15, %17 : vector<8x21xf32>
    %cst_7 = arith.constant 0.000000e+00 : f32
    %19 = vector.broadcast %cst_7 : f32 to vector<8x21xf32>
    %20 = arith.maximumf %18, %19 : vector<8x21xf32>
    %21 = arith.truncf %20 : vector<8x21xf32> to vector<8x21xbf16>
    %cst_8 = arith.constant dense<0.000000e+00> : vector<8x21xf32>
    %22 = tpu.matmul %21, %3, %cst_8 {dimension_numbers = #tpu.dot_dimension_numbers<[1], [0], [0], [1], [0, 0, 1, 1], [], []>} : vector<8x21xbf16>, vector<21x21xbf16>, vector<8x21xf32> -> vector<8x21xf32>
    %23 = vector.extract_strided_slice %10 {offsets = [1, 0], sizes = [1, 21], strides = [1, 1]} : vector<8x21xf32> to vector<1x21xf32>
    %24 = vector.broadcast %23 : vector<1x21xf32> to vector<8x21xf32>
    %25 = arith.addf %22, %24 : vector<8x21xf32>
    %cst_9 = arith.constant 0.000000e+00 : f32
    %26 = vector.broadcast %cst_9 : f32 to vector<8x21xf32>
    %27 = arith.maximumf %25, %26 : vector<8x21xf32>
    %28 = arith.truncf %27 : vector<8x21xf32> to vector<8x21xbf16>
    %cst_10 = arith.constant dense<0.000000e+00> : vector<8x21xf32>
    %29 = tpu.matmul %28, %5, %cst_10 {dimension_numbers = #tpu.dot_dimension_numbers<[1], [0], [0], [1], [0, 0, 1, 1], [], []>} : vector<8x21xbf16>, vector<21x21xbf16>, vector<8x21xf32> -> vector<8x21xf32>
    %30 = vector.extract_strided_slice %10 {offsets = [2, 0], sizes = [1, 21], strides = [1, 1]} : vector<8x21xf32> to vector<1x21xf32>
    %31 = vector.broadcast %30 : vector<1x21xf32> to vector<8x21xf32>
    %32 = arith.addf %29, %31 : vector<8x21xf32>
    %cst_11 = arith.constant 0.000000e+00 : f32
    %33 = vector.broadcast %cst_11 : f32 to vector<8x21xf32>
    %34 = arith.maximumf %32, %33 : vector<8x21xf32>
    %35 = arith.truncf %34 : vector<8x21xf32> to vector<8x21xbf16>
    %cst_12 = arith.constant dense<0.000000e+00> : vector<8x21xf32>
    %36 = tpu.matmul %35, %7, %cst_12 {dimension_numbers = #tpu.dot_dimension_numbers<[1], [0], [0], [1], [0, 0, 1, 1], [], []>} : vector<8x21xbf16>, vector<21x21xbf16>, vector<8x21xf32> -> vector<8x21xf32>
    %37 = vector.extract_strided_slice %10 {offsets = [3, 0], sizes = [1, 21], strides = [1, 1]} : vector<8x21xf32> to vector<1x21xf32>
    %38 = vector.broadcast %37 : vector<1x21xf32> to vector<8x21xf32>
    %39 = arith.addf %36, %38 : vector<8x21xf32>
    %cst_13 = arith.constant 0.000000e+00 : f32
    %40 = vector.broadcast %cst_13 : f32 to vector<8x21xf32>
    %41 = arith.maximumf %39, %40 : vector<8x21xf32>
    %42 = arith.truncf %41 : vector<8x21xf32> to vector<8x21xbf16>
    %cst_14 = arith.constant dense<0.000000e+00> : vector<8x21xf32>
    %43 = tpu.matmul %42, %9, %cst_14 {dimension_numbers = #tpu.dot_dimension_numbers<[1], [0], [0], [1], [0, 0, 1, 1], [], []>} : vector<8x21xbf16>, vector<21x21xbf16>, vector<8x21xf32> -> vector<8x21xf32>
    %44 = vector.extract_strided_slice %10 {offsets = [4, 0], sizes = [1, 21], strides = [1, 1]} : vector<8x21xf32> to vector<1x21xf32>
    %45 = vector.broadcast %44 : vector<1x21xf32> to vector<8x21xf32>
    %46 = arith.addf %43, %45 : vector<8x21xf32>
    %47 = arith.index_cast %12 : i32 to index
    %c0_15 = arith.constant 0 : index
    %48 = vector.load %arg3[%47, %c0_15] : memref<8x21xf32, #tpu.memory_space<vmem>>, vector<8x21xf32>
    tpu.vector_store %arg3[%47, %c0_15], %46 {strides = array<i32>} : memref<8x21xf32, #tpu.memory_space<vmem>>, vector<8x21xf32>,
    %c1_i32 = arith.constant 1 : i32
    return
  }
  func.func @transform_0(%arg0: i32) -> (i32, i32) {
    %c0_i32 = arith.constant 0 : i32
    %c0_i32_0 = arith.constant 0 : i32
    return %arg0, %c0_i32 : i32, i32
  }
  func.func @transform_1(%arg0: i32) -> (i32, i32) {
    %c0_i32 = arith.constant 0 : i32
    %c0_i32_0 = arith.constant 0 : i32
    %c0_i32_1 = arith.constant 0 : i32
    return %c0_i32, %c0_i32_0 : i32, i32
  }
  func.func @transform_2(%arg0: i32) -> (i32, i32) {
    %c0_i32 = arith.constant 0 : i32
    %c0_i32_0 = arith.constant 0 : i32
    return %arg0, %c0_i32 : i32, i32
  }
}

</mosaic_0001>

<bundles_post_ra>
// kernel: model3_forward.1
= control target key start
LH: loop header
LB: loop body
LE: loop exit
PB: predicated region body
PF: predicated region fallthrough
CT: control target
= control target key end

     0   :  { %vm63_vm0 = vcmask 1046528   ;;  %vm59_vm1 = vcmask 1031168   ;;  %vm87_vm2 = vcmask 1041408   ;;  %vm88_vm3 = vcmask 1042432   ;;  %s298_s1 = inlined_call_operand.vmem [shape: f32[232,21], index: 1, kind: input, shape index: {}]   ;;  %s299_s0 = inlined_call_operand.vmem [shape: bf16[8,126], index: 0, kind: input, shape index: {}]   ;;  %s300_s2 = inlined_call_operand.vmem [shape: f32[8,21], index: 2, kind: output, shape index: {}]  }
   0x1   :  { %v26_v0 = vld [vmem:[%s298_s1 + $0x70] sm:$0xff]  ;;  %v27_v1 = vld [vmem:[%s298_s1 + $0x78] sm:$0x3f]  ;;  %v24_v3 = vld [vmem:[%s298_s1 + $0x60] sm:$0xff]  ;;  %v184_v28 = vmov 65535   ;;  %vm83_vm4 = vcmask 171008  }
   0x2   :  { %v35_v2 = vpack.c.bf16 %v27_v1, %v26_v0  ;;  %v25_v4 = vld [vmem:[%s298_s1 + $0x68] sm:$0xff]  ;;  %v22_v7 = vld [vmem:[%s298_s1 + $0x50] sm:$0xff]  ;;  %v23_v8 = vld [vmem:[%s298_s1 + $0x58] sm:$0xff]  ;;  %v89_v29 = vsel %vm87_vm2, 4294967295, %v184_v28 }
   0x3   :  { %v34_v6 = vpack.c.bf16 %v25_v4, %v24_v3  ;;  %v33_v9 = vpack.c.bf16 %v23_v8, %v22_v7  ;;  %v20_v10 = vld [vmem:[%s298_s1 + $0x40] sm:$0xff]  ;;  %v21_v11 = vld [vmem:[%s298_s1 + $0x48] sm:$0xff]  ;;  %v18_v13 = vld [vmem:[%s298_s1 + $0x30] sm:$0xff]  ;;  %v90_v30 = vsel %vm88_vm3, %v89_v29, 0 }
   0x4   :  { %v65_v5 = vsel %vm63_vm0, %v35_v2, 0  ;;  %v32_v12 = vpack.c.bf16 %v21_v11, %v20_v10  ;;  %v19_v14 = vld [vmem:[%s298_s1 + $0x38] sm:$0xff]  ;;  %v16_v16 = vld [vmem:[%s298_s1 + $0x20] sm:$0xff]  ;;  %v17_v17 = vld [vmem:[%s298_s1 + $0x28] sm:$0xff] }
   0x5   :  { %67 = vmatpush.bf16.msra.mxu0 %v65_v5  ;;  %v31_v15 = vpack.c.bf16 %v19_v14, %v18_v13  ;;  %v30_v18 = vpack.c.bf16 %v17_v17, %v16_v16  ;;  %v14_v19 = vld [vmem:[%s298_s1 + $0x10] sm:$0xff]  ;;  %v15_v20 = vld [vmem:[%s298_s1 + $0x18] sm:$0xff]  ;;  %v12_v22 = vld [vmem:[%s298_s1] sm:$0xff] }
   0x6   :  { %v29_v21 = vpack.c.bf16 %v15_v20, %v14_v19  ;;  %v13_v23 = vld [vmem:[%s298_s1 + $0x8] sm:$0xff]  ;;  %v57_v25 = vld [vmem:[%s299_s0] sm:$0xf]  ;;  %v38_v26 = vld [vmem:[%s298_s1 + $0x90] sm:$0x1f] }
   0x7   :  { %v28_v24 = vpack.c.bf16 %v13_v23, %v12_v22  ;;  %v40_v27 = vpack.c.bf16 %v38_v26, %v38_v26  ;;  %v36_v32 = vld [vmem:[%s298_s1 + $0x80] sm:$0xff]  ;;  %v37_v33 = vld [vmem:[%s298_s1 + $0x88] sm:$0xff]  ;;  %v41_v45 = vld [vmem:[%s298_s1 + $0x98] sm:$0xff] }
   0x8   :  { %v39_v34 = vpack.c.bf16 %v37_v33, %v36_v32  ;;  %v56_v35 = vld [vmem:[%s298_s1 + $0xe0] sm:$0xff]  ;;  %v43_v42 = vld [vmem:[%s298_s1 + $0xa8] sm:$0x1f]  ;;  %v46_v57 = vld [vmem:[%s298_s1 + $0xb0] sm:$0xff] }
   0x9   :  { %68 = vmatpush.bf16.msra.mxu0 %v34_v6  ;;  %v92_v31 = vand.u32 %v90_v30, %v40_v27  ;;  %v58_v36 = vperm.slane %v56_v35, 0  ;;  %v45_v43 = vpack.c.bf16 %v43_v42, %v43_v42  ;;  %v42_v46 = vld [vmem:[%s298_s1 + $0xa0] sm:$0xff]  ;;  %v82_v48 = vperm.slane %v56_v35, 1  ;;  %v47_v58 = vld [vmem:[%s298_s1 + $0xb8] sm:$0xff]  ;;  %v51_v62 = vld [vmem:[%s298_s1 + $0xc8] sm:$0xff] }
   0xa   :  { %v44_v47 = vpack.c.bf16 %v42_v46, %v41_v45  ;;  %v48_v54 = vld [vmem:[%s298_s1 + $0xc0] sm:$0x1f]  ;;  %v49_v59 = vpack.c.bf16 %v47_v58, %v46_v57  ;;  %v53_v60 = vld [vmem:[%s298_s1 + $0xd8] sm:$0x1f]  ;;  %v52_v63 = vld [vmem:[%s298_s1 + $0xd0] sm:$0xff]  ;;  %v109_v2 = vperm.slane %v56_v35, 2 }
   0xb   :  { %100 = vmatpush.bf16.msra.mxu1 %v92_v31  ;;  %v114_v44 = vand.u32 %v90_v30, %v45_v43  ;;  %v50_v55 = vpack.c.bf16 %v48_v54, %v48_v54  ;;  %v55_v61 = vpack.c.bf16 %v53_v60, %v53_v60  ;;  %v54_v1 = vpack.c.bf16 %v52_v63, %v51_v62 }
   0xc   :  { %v131_v8 = vperm.slane %v56_v35, 3  ;;  %v153_v14 = vperm.slane %v56_v35, 4 }
   0xd   :  { %69 = vmatpush.bf16.msra.mxu0 %v33_v9  ;;  %122 = vmatpush.bf16.msra.mxu2 %v114_v44  ;;  %v136_v56 = vand.u32 %v90_v30, %v50_v55  ;;  %v158_v0 = vand.u32 %v90_v30, %v55_v61 }
   0xf   :  { %101 = vmatpush.bf16.msra.mxu1 %v39_v34  ;;  %144 = vmatpush.bf16.msra.mxu3 %v136_v56 }
  0x11   :  { %70 = vmatpush.bf16.msra.mxu0 %v32_v12  ;;  %123 = vmatpush.bf16.msra.mxu2 %v44_v47 }
  0x13   :  { %145 = vmatpush.bf16.msra.mxu3 %v49_v59  ;;  %166 = vmatpush.bf16.msrb.mxu1 %v158_v0 }
  0x15   :  { %71 = vmatpush.bf16.msra.mxu0 %v31_v15 }
  0x17   :  { %167 = vmatpush.bf16.msrb.mxu1 %v54_v1 }
  0x19   :  { %72 = vmatpush.bf16.msra.mxu0 %v30_v18 }
  0x1d   :  { %73 = vmatpush.bf16.msra.mxu0 %v29_v21 }
  0x21   :  { %74 = vmatpush.bf16.msra.mxu0 %v28_v24 }
  0x24   :  { %178 = vmatmul.msk.bf16.vlgmr.msra.gmra.mxu0 %vm59_vm1, %v57_v25 }
  0xa1   :  { %v76_v37 = vpop.f32.mrf.mxu0 }
  0xa2   :  { %v77_v38 = vadd.f32 %v76_v37, %v58_v36 }
  0xa4   :  { %v80_v39 = vmax.f32 %v77_v38, 0.0 }
  0xa6   :  { %v81_v40 = vpack.c.bf16 %v80_v39, %v80_v39 }
  0xa8   :  { %179 = vmatmul.msk.bf16.vlgmr.msra.gmra.mxu1 %vm83_vm4, %v81_v40 }
  0xa9   :  { %v78_v41 = vpop.f32.mrf.mxu0 }
 0x125   :  { %v103_v49 = vpop.f32.mrf.mxu1 }
 0x126   :  { %v104_v50 = vadd.f32 %v103_v49, %v82_v48 }
 0x128   :  { %v107_v51 = vmax.f32 %v104_v50, 0.0 }
 0x12a   :  { %v108_v52 = vpack.c.bf16 %v107_v51, %v107_v51 }
 0x12c   :  { %180 = vmatmul.msk.bf16.vlgmr.msra.gmra.mxu2 %vm83_vm4, %v108_v52 }
 0x12d   :  { %v105_v53 = vpop.f32.mrf.mxu1 }
 0x1af   :  { %v125_v3 = vpop.f32.mrf.mxu2 }
 0x1b0   :  { %v126_v4 = vadd.f32 %v125_v3, %v109_v2 }
 0x1b2   :  { %v129_v5 = vmax.f32 %v126_v4, 0.0 }
 0x1b4   :  { %v130_v6 = vpack.c.bf16 %v129_v5, %v129_v5 }
 0x1b6   :  { %181 = vmatmul.msk.bf16.vlgmr.msra.gmra.mxu3 %vm83_vm4, %v130_v6 }
 0x1b7   :  { %v127_v7 = vpop.f32.mrf.mxu2 }
 0x239   :  { %v147_v9 = vpop.f32.mrf.mxu3 }
 0x23a   :  { %v148_v10 = vadd.f32 %v147_v9, %v131_v8 }
 0x23c   :  { %v151_v11 = vmax.f32 %v148_v10, 0.0 }
 0x23e   :  { %v152_v12 = vpack.c.bf16 %v151_v11, %v151_v11 }
 0x240   :  { %182 = vmatmul.msk.bf16.vlgmr.msrb.gmra.mxu1 %vm83_vm4, %v152_v12 }
 0x241   :  { %v149_v13 = vpop.f32.mrf.mxu3 }
 0x2bd   :  { %v169_v15 = vpop.f32.mrf.mxu1 }
 0x2be   :  { %v170_v16 = vadd.f32 %v169_v15, %v153_v14 }
 0x2c0   :  { %173 = vst.msk [vmem:[%s300_s2] sm:$0xff] %vm83_vm4, %v170_v16 }
 0x2c5   :  { %v171_v17 = vpop.f32.mrf.mxu1 }

</bundles_post_ra>
